<compile_context>
chip_gen: v7x
topology: tpu7x:2x2x1
jax: 0.10.0
libtpu: 0.0.40
codegen_flags: <defaults>
</compile_context>

<pallas_src>
import jax
import jax.numpy as jnp
from jax.experimental import pallas as pl
from jax.experimental.pallas import tpu as pltpu

EPSILON = 1e-07


def _coord_norm_kernel(scale_ref, x_ref, o_ref):
    # scale_ref: (1,) f32 in SMEM  (the learnable nn.Parameter scale)
    # x_ref:     (D, tile_n) coords tile in VMEM (nodes on lanes -> lane-dense)
    # o_ref:     (D, tile_n) output tile in VMEM
    x = x_ref[...].astype(jnp.float32)
    # L2 norm over the coordinate axis (sublane reduce, keepdims -> (1, tile_n))
    sumsq = jnp.sum(x * x, axis=0, keepdims=True)
    norm = jnp.sqrt(sumsq)                                   # EUP
    # Fold the scale into the narrow per-node inverse; exact reciprocal keeps
    # results within the 1e-5 tolerance of the torch reference.
    inv = scale_ref[0] * pl.reciprocal(norm + EPSILON, approx=False)
    o_ref[...] = (x * inv).astype(o_ref.dtype)


def _round_up(x: int, m: int) -> int:
    return ((x + m - 1) // m) * m


def coordinate_normalization(coords: jax.Array, scale: jax.Array,
                             *, tile_n: int = 4096) -> jax.Array:
    """coords: (N, D) array, scale: (1,) parameter. Returns (N, D).

    Internally processes a lane-dense (D, N_pad) view tiled along the node
    axis.  tile_n is clamped to a multiple of 128 lanes; N is zero-padded so
    any graph size works (no divisibility requirement).  For very small N
    this degenerates to a single grid step.
    """
    N, D = coords.shape
    # Lane tile: multiple of 128, no larger than needed for small inputs.
    tile = _round_up(min(tile_n, _round_up(N, 128)), 128)
    n_pad = _round_up(N, tile)
    grid = (n_pad // tile,)

    # Transpose to D-major and zero-pad nodes (layout plumbing in the wrapper).
    x_t = jnp.zeros((D, n_pad), coords.dtype).at[:, :N].set(coords.T)

    out_t = pl.pallas_call(
        _coord_norm_kernel,
        out_shape=jax.ShapeDtypeStruct((D, n_pad), coords.dtype),
        grid_spec=pltpu.PrefetchScalarGridSpec(
            num_scalar_prefetch=0,
            grid=grid,
            in_specs=[
                pl.BlockSpec(memory_space=pltpu.SMEM),          # scale (scalar param)
                pl.BlockSpec((D, tile), lambda i: (0, i)),      # coords tile (lane-dense)
            ],
            out_specs=pl.BlockSpec((D, tile), lambda i: (0, i)),
        ),
        compiler_params=pltpu.CompilerParams(
            dimension_semantics=("parallel",)),                  # shards across v7x's 2 TCs
    )(scale, x_t)

    return out_t[:, :N].T


def _reference(coords, scale):
    norm = jnp.linalg.norm(coords, axis=-1, keepdims=True)
    return coords / (norm + EPSILON) * scale


if __name__ == "__main__":
    key = jax.random.PRNGKey(0)
    k_coords, k_scale = jax.random.split(key)

    # Small EGNN-like shapes: 128 nodes, 3-D coordinates.
    N, D = 128, 3
    coords = jax.random.normal(k_coords, (N, D), dtype=jnp.float32)
    # nn.Parameter(torch.rand(1)) -> deterministic uniform[0,1) scalar
    scale = jax.random.uniform(k_scale, (1,), dtype=jnp.float32)

    out = jax.block_until_ready(coordinate_normalization(coords, scale))
    ref = _reference(coords, scale)
    assert out.shape == coords.shape and out.dtype == coords.dtype
    assert jnp.allclose(out, ref, atol=1e-5, rtol=1e-5), "mismatch vs reference"

    # Ragged node count (not a multiple of the tile) + multi-step grid.
    N2 = 300
    coords2 = jax.random.normal(jax.random.PRNGKey(1), (N2, D), dtype=jnp.float32)
    out2 = jax.block_until_ready(
        coordinate_normalization(coords2, scale, tile_n=128))
    ref2 = _reference(coords2, scale)
    assert out2.shape == coords2.shape
    assert jnp.allclose(out2, ref2, atol=1e-5, rtol=1e-5), "mismatch (ragged)"

    print("KERNEL_OK")
</pallas_src>

<mosaic_0001>
module attributes {stable_mosaic.version = 11 : i64} {
  func.func @_coord_norm_kernel(%arg0: i32, %arg1: memref<1xf32, #tpu.memory_space<smem>>, %arg2: memref<3x128xf32, #tpu.memory_space<vmem>>, %arg3: memref<3x128xf32, #tpu.memory_space<vmem>>) attributes {dimension_semantics = [#tpu.dimension_semantics<parallel>], iteration_bounds = array<i64: 1>, scalar_prefetch = 0 : i64, scratch_operands = 0 : i64, tpu.core_type = #tpu.core_type<tc>, window_params = [{transform_indices = @transform_0, window_bounds = array<i64: 1>}, {transform_indices = @transform_1, window_bounds = array<i64: 3, 128>}, {transform_indices = @transform_2, window_bounds = array<i64: 3, 128>}]} {
    %c0 = arith.constant 0 : index
    %c0_0 = arith.constant 0 : index
    %0 = vector.load %arg2[%c0, %c0_0] : memref<3x128xf32, #tpu.memory_space<vmem>>, vector<3x128xf32>
    %1 = arith.mulf %0, %0 : vector<3x128xf32>
    %cst = arith.constant dense<0.000000e+00> : vector<128xf32>
    %2 = vector.multi_reduction <add>, %1, %cst [0] : vector<3x128xf32> to vector<128xf32>
    %3 = vector.shape_cast %2 : vector<128xf32> to vector<1x128xf32>
    %4 = math.sqrt %3 : vector<1x128xf32>
    %c0_1 = arith.constant 0 : index
    %5 = memref.load %arg1[%c0_1] : memref<1xf32, #tpu.memory_space<smem>>
    %cst_2 = arith.constant 1.000000e-07 : f32
    %6 = vector.broadcast %cst_2 : f32 to vector<1x128xf32>
    %7 = arith.addf %4, %6 : vector<1x128xf32>
    %8 = tpu.reciprocal %7 : vector<1x128xf32> -> vector<1x128xf32>
    %9 = vector.broadcast %5 : f32 to vector<1x128xf32>
    %10 = arith.mulf %9, %8 : vector<1x128xf32>
    %11 = vector.broadcast %10 : vector<1x128xf32> to vector<3x128xf32>
    %12 = arith.mulf %0, %11 : vector<3x128xf32>
    %c0_3 = arith.constant 0 : index
    %c0_4 = arith.constant 0 : index
    %13 = vector.load %arg3[%c0_3, %c0_4] : memref<3x128xf32, #tpu.memory_space<vmem>>, vector<3x128xf32>
    tpu.vector_store %arg3[%c0_3, %c0_4], %12 {strides = array<i32>} : memref<3x128xf32, #tpu.memory_space<vmem>>, vector<3x128xf32>,
    return
  }
  func.func @transform_0(%arg0: i32) -> i32 {
    %c0_i32 = arith.constant 0 : i32
    %c0_i32_0 = arith.constant 0 : i32
    return %c0_i32 : i32
  }
  func.func @transform_1(%arg0: i32) -> (i32, i32) {
    %c0_i32 = arith.constant 0 : i32
    %c0_i32_0 = arith.constant 0 : i32
    return %c0_i32, %arg0 : i32, i32
  }
  func.func @transform_2(%arg0: i32) -> (i32, i32) {
    %c0_i32 = arith.constant 0 : i32
    %c0_i32_0 = arith.constant 0 : i32
    return %c0_i32, %arg0 : i32, i32
  }
}

</mosaic_0001>

<bundles_post_ra>
// kernel: tpu_custom_call.1
= control target key start
LH: loop header
LB: loop body
LE: loop exit
PB: predicated region body
PF: predicated region fallthrough
CT: control target
= control target key end

     0   :  { %8 = vsyncpa [#allocation4], 0  ;;  %s162_s0 = inlined_call_operand.<no memory space> [shape: f32[1], index: 0, kind: input, shape index: {}]   ;;  %s163_s1 = inlined_call_operand.hbm [shape: f32[3,128], index: 1, kind: input, shape index: {}]   ;;  %s164_s2 = inlined_call_operand.hbm [shape: f32[3,128], index: 2, kind: output, shape index: {}]  }
   0x1   :  { %9 = vsyncpa [#allocation5], 0  ;;  %s118_s9 = smov [#allocation3]   ;;  %s70_s13 = scalar_lea.hbm %s163_s1, 64 }
   0x2   :  { %s18_s10 = sshll.u32 %s118_s9, 4  ;;  %p71_p0 = scmp.ne.s32.totalorder %s163_s1, %s70_s13  ;;  %s19_s10 = int_to_ptr.vmem [resolvable:$true] %s18_s10 }
   0x3   :  { %p74_p1 = scmp.lt.u32.totalorder %s70_s13, %s163_s1 }
   0x5   :  { %p76_p2 = pnand %p74_p1, %p71_p0 }
   0x7   :  { %79 = shalt.err (!%p76_p2)
}
   0x8   :  { %s80_s18 = scalar_lea.vmem %s19_s10, 64  ;;  %p85_p4 = scmp.lt.s32.totalorder %s19_s10, %s19_s10 }
   0x9   :  { %p81_p3 = scmp.ne.s32.totalorder %s19_s10, %s80_s18  ;;  %p86_p5 = scmp.lt.s32.totalorder %s80_s18, %s80_s18 }
   0xb   :  { %p87_p6 = por %p86_p5, %p85_p4 }
   0xd   :  { %p88_p7 = pnand %p87_p6, %p81_p3 }
   0xf   :  { %91 = shalt.err (!%p88_p7)
}
  0x10   :  { %21 = dma.hbm_to_vmem [thread:$0]  %s163_s1, 64, %s19_s10, [#allocation4]  }
  0x11   :  { %114 = dma.done.wait [#allocation4], 64  }
  0x12   :  { %115 = vsyncadd [#allocation4], 4294967232  ;;  %v25_v0 = vld [vmem:[#allocation3] sm:$0x7]  ;;  %vm27_vm0 = vcmask 1042432   ;;  %v45_v15 = vstv %s162_s0  ;;  %s119_s22 = smov [#allocation6]  }
  0x13   :  { %v26_v1 = vmul.f32 %v25_v0, %v25_v0  ;;  %s55_s23 = sshll.u32 %s119_s22, 4  ;;  %s56_s23 = int_to_ptr.vmem [resolvable:$true] %s55_s23 }
  0x14   :  { %s92_s24 = scalar_lea.vmem %s56_s23, 64  ;;  %p97_p9 = scmp.lt.s32.totalorder %s56_s23, %s56_s23 }
  0x15   :  { %v28_v2 = vsel %vm27_vm0, %v26_v1, 0.0  ;;  %p93_p8 = scmp.ne.s32.totalorder %s56_s23, %s92_s24  ;;  %p98_p10 = scmp.lt.s32.totalorder %s92_s24, %s92_s24 }
  0x16   :  { %v29_v3 = vrot.slane %v28_v2, 4 }
  0x17   :  { %p99_p11 = por %p98_p10, %p97_p9 }
  0x18   :  { %v30_v4 = vadd.f32 %v29_v3, %v28_v2 }
  0x19   :  { %p100_p12 = pnand %p99_p11, %p93_p8 }
  0x1a   :  { %v31_v5 = vrot.slane %v30_v4, 2 }
  0x1c   :  { %v32_v6 = vadd.f32 %v31_v5, %v30_v4 }
  0x1e   :  { %v33_v7 = vrot.slane %v32_v6, 1 }
  0x20   :  { %v34_v8 = vadd.f32 %v33_v7, %v32_v6 }
  0x22   :  { %66 = vrsqrt.f32 %v34_v8  ;;  %vm37_vm1 = vcmp.eq.f32.partialorder %v34_v8, inf  ;;  %v40_v10 = vand.u32 2147483648, %v34_v8  ;;  %vm39_vm2 = vcmp.eq.f32.partialorder %v34_v8, 0.0 }
  0x2c   :  { %v67_v9 = vpop.eup %66 }
  0x2d   :  { %v36_v11 = vmul.f32 %v67_v9, %v34_v8 }
  0x2f   :  { %v38_v12 = vsel %vm37_vm1, %v34_v8, %v36_v11 }
  0x30   :  { %v41_v13 = vsel %vm39_vm2, %v40_v10, %v38_v12 }
  0x31   :  { %v43_v14 = vadd.f32 1e-07, %v41_v13 }
  0x33   :  { %68 = vrcp.f32 %v43_v14 }
  0x3d   :  { %v69_v16 = vpop.eup %68 }
  0x3e   :  { %v46_v17 = vmul.f32 %v69_v16, %v45_v15 }
  0x40   :  { %v47_v18 = vmul.f32 %v46_v17, %v25_v0 }
  0x42   :  { %48 = vst [vmem:[#allocation6] sm:$0x7] %v47_v18 }
  0x43   :  { %103 = shalt.err (!%p100_p12)
}
  0x44   :  { %s104_s27 = scalar_lea.hbm %s164_s2, 64 }
  0x45   :  { %p105_p13 = scmp.ne.s32.totalorder %s164_s2, %s104_s27  ;;  %p108_p0 = scmp.lt.u32.totalorder %s104_s27, %s164_s2 }
  0x47   :  { %p110_p1 = pnand %p108_p0, %p105_p13 }
  0x49   :  { %113 = shalt.err (!%p110_p1)
}
  0x4a   :  { %58 = dma.vmem_to_hbm [thread:$0]  %s56_s23, 64, %s164_s2, [#allocation5]  }
  0x4b   :  { %116 = dma.done.wait [#allocation5], 64  }
  0x4c   :  { %117 = vsyncadd [#allocation5], 4294967232 }
  0x4d   :  { %62 = vsyncpa [#allocation4], 1 }
  0x4e   :  { %63 = vsyncpa [#allocation5], 1 }

</bundles_post_ra>
